<compile_context>
chip_gen: v5e
topology: v5e:2x2
jax: 0.10.0
libtpu: 0.0.40
codegen_flags: <defaults>
</compile_context>

<pallas_src>
import math

import jax
import jax.numpy as jnp
from jax.experimental import pallas as pl
from jax.experimental.pallas import tpu as pltpu


def _round_up(x: int, m: int) -> int:
    return ((x + m - 1) // m) * m


def _make_fused_mlp_kernel(nlayer: int):
    """Kernel over one batch tile: chain nlayer Linear(+ReLU) ops in VMEM."""

    def kernel(x_ref, *refs):
        # refs = (w0, b0, w1, b1, ..., w_{n-1}, b_{n-1}, o_ref)
        o_ref = refs[-1]
        h = x_ref[...]  # f32 (bt, Din0_pad)
        for layer in range(nlayer):
            w_ref = refs[2 * layer]       # bf16 (Din_pad, Dout_pad), VMEM-resident
            b_ref = refs[2 * layer + 1]   # f32  (1, Dout_pad)
            h = jnp.dot(h.astype(jnp.bfloat16), w_ref[...],
                        preferred_element_type=jnp.float32)
            h = h + b_ref[...]            # broadcasts over the batch tile
            if layer < nlayer - 1:
                h = jnp.maximum(h, 0.0)
        o_ref[...] = h.astype(o_ref.dtype)

    return kernel


def init_mlp_params(size_list, key):
    """Deterministic init mimicking nn.Linear defaults: U(-1/sqrt(in), 1/sqrt(in))."""
    params = []
    nlayer = len(size_list) - 1
    for layer in range(nlayer):
        din, dout = size_list[layer], size_list[layer + 1]
        key, kw, kb = jax.random.split(key, 3)
        bound = 1.0 / math.sqrt(din)
        # stored as (Din, Dout) == PyTorch weight.T so the kernel computes x @ W + b
        w = jax.random.uniform(kw, (din, dout), jnp.float32, minval=-bound, maxval=bound)
        b = jax.random.uniform(kb, (dout,), jnp.float32, minval=-bound, maxval=bound)
        params.append((w, b))
    return params


class MLPnetPallas:
    """Fused Pallas equivalent of MLPnet.forward (flatten -> Linear/ReLU stack)."""

    def __init__(self, size_list, params, *, max_batch_tile=512):
        assert len(params) == len(size_list) - 1
        self.size_list = tuple(int(d) for d in size_list)
        self.nlayer = len(self.size_list) - 1
        self.max_batch_tile = int(max_batch_tile)
        self.dims_pad = tuple(_round_up(d, 128) for d in self.size_list)

        # ---- pad weights/biases ONCE and cache (review: hoist out of forward) ----
        flat = []
        weight_bytes = 0
        for layer, (w, b) in enumerate(params):
            din, dout = self.size_list[layer], self.size_list[layer + 1]
            dpi, dpo = self.dims_pad[layer], self.dims_pad[layer + 1]
            w_p = jnp.zeros((dpi, dpo), jnp.bfloat16).at[:din, :dout].set(
                jnp.asarray(w, jnp.bfloat16))
            b_p = jnp.zeros((1, dpo), jnp.float32).at[0, :dout].set(
                jnp.asarray(b, jnp.float32))
            flat.extend((w_p, b_p))
            weight_bytes += dpi * dpo * 2 + dpo * 4
        self.flat_params = tuple(flat)
        self._weight_bytes = weight_bytes

        # ---- fit guard for the whole-stack-resident design (v7x: 64 MiB VMEM) ----
        # TODO(synk): if a single padded weight exceeds ~16 MiB, add an
        # output-feature grid axis (or inner emit_pipeline) for that layer
        # instead of requiring the entire weight stack to be VMEM-resident.
        if weight_bytes > 40 << 20:
            raise ValueError(
                f"Resident weight footprint {weight_bytes / 2**20:.1f} MiB is too large "
                "for the whole-stack-in-VMEM design; per-layer output tiling needed.")

        self._fwd = None  # jitted forward, selected lazily (single vs double buffered)

    # ------------------------------------------------------------------ build
    def _build_forward(self, weight_buffer_count):
        size_list = self.size_list
        dims_pad = self.dims_pad
        nlayer = self.nlayer
        max_bt = self.max_batch_tile
        weight_bytes = self._weight_bytes

        def fwd(x, *flat_params):
            # flatten exactly like torch's x.view(-1, size_list[0])
            x2 = x.reshape(-1, size_list[0]).astype(jnp.float32)
            B = x2.shape[0]
            d0, dL = size_list[0], size_list[-1]
            dp0, dpL = dims_pad[0], dims_pad[-1]

            B8 = _round_up(max(B, 1), 8)
            bt = min(max_bt, B8)                 # batch tile (multiple of 8)
            B_pad = _round_up(B8, bt)
            n_tiles = B_pad // bt

            x_p = jnp.zeros((B_pad, dp0), jnp.float32).at[:B, :d0].set(x2)

            def make_resident_spec(shape):
                # constant index_map -> DMA'd once; single-buffer when supported
                if weight_buffer_count is not None and hasattr(pl, "Buffered"):
                    return pl.BlockSpec(shape, lambda i: (0, 0),
                                        pipeline_mode=pl.Buffered(weight_buffer_count))
                return pl.BlockSpec(shape, lambda i: (0, 0))

            in_specs = [pl.BlockSpec((bt, dp0), lambda i: (i, 0))]
            for layer in range(nlayer):
                dpi, dpo = dims_pad[layer], dims_pad[layer + 1]
                in_specs.append(make_resident_spec((dpi, dpo)))   # weight
                in_specs.append(make_resident_spec((1, dpo)))     # bias
            out_spec = pl.BlockSpec((bt, dpL), lambda i: (i, 0))

            # VMEM budget from the actual footprint, capped below v7x's 64 MiB.
            io_bytes = 2 * bt * dp0 * 4 + 2 * bt * dpL * 4   # double-buffered x / out
            act_bytes = 2 * bt * max(dims_pad) * 4           # intermediate activations
            vmem_limit = int(max(16 << 20,
                                 min(48 << 20,
                                     2 * (weight_bytes + io_bytes + act_bytes) + (8 << 20))))

            flops = 2 * B_pad * sum(dims_pad[l] * dims_pad[l + 1] for l in range(nlayer))
            bytes_accessed = B_pad * dp0 * 4 + weight_bytes + B_pad * dpL * 4
            cost = pl.CostEstimate(flops=int(flops), transcendentals=0,
                                   bytes_accessed=int(bytes_accessed))

            out_padded = pl.pallas_call(
                _make_fused_mlp_kernel(nlayer),
                out_shape=jax.ShapeDtypeStruct((B_pad, dpL), jnp.float32),
                grid=(n_tiles,),
                in_specs=in_specs,
                out_specs=out_spec,
                compiler_params=pltpu.CompilerParams(
                    # only split across TensorCores when there is real work per core
                    dimension_semantics=("parallel",) if n_tiles >= 2 else ("arbitrary",),
                    vmem_limit_bytes=vmem_limit,
                ),
                cost_estimate=cost,
            )(x_p, *flat_params)

            # slice the real rows/columns back out
            return out_padded[:B, :dL]

        return jax.jit(fwd)

    # ------------------------------------------------------------------ call
    def __call__(self, x):
        if self._fwd is None:
            last_err = None
            # Prefer single-buffered resident weights (halves their VMEM footprint);
            # fall back to default double-buffering if pipeline_mode is unsupported.
            for buf_count in (1, None):
                fn = self._build_forward(buf_count)
                try:
                    out = jax.block_until_ready(fn(x, *self.flat_params))
                except Exception as e:  # noqa: BLE001 - fallback on lowering rejection
                    last_err = e
                    continue
                self._fwd = fn
                return out
            raise last_err
        return self._fwd(x, *self.flat_params)


if __name__ == "__main__":
    # size_list: [input_dim, hidden..., output_dim]; input is (batch, width, width)
    width = 16
    size_list = [width * width, 64, 32, 10]
    batch = 2

    key = jax.random.PRNGKey(0)
    key, kx = jax.random.split(key)
    x = jax.random.normal(kx, (batch, width, width), jnp.float32)

    params = init_mlp_params(size_list, key)
    model = MLPnetPallas(size_list, params, max_batch_tile=512)

    out = jax.block_until_ready(model(x))

    # plain-JAX f32 reference (kernel matmuls are bf16 with f32 accumulation,
    # so compare with a relaxed tolerance)
    ref = x.reshape(-1, size_list[0])
    for layer, (w, b) in enumerate(params):
        ref = ref @ w + b
        if layer < len(params) - 1:
            ref = jnp.maximum(ref, 0.0)

    assert out.shape == (batch, size_list[-1])
    assert jnp.allclose(out, ref, atol=5e-2, rtol=5e-2), float(jnp.max(jnp.abs(out - ref)))

    print("KERNEL_OK")
</pallas_src>

<mosaic_0001>
module attributes {stable_mosaic.version = 11 : i64} {
  func.func @kernel(%arg0: i32, %arg1: memref<8x256xf32, #tpu.memory_space<vmem>>, %arg2: memref<256x128xbf16, #tpu.memory_space<vmem>>, %arg3: memref<1x128xf32, #tpu.memory_space<vmem>>, %arg4: memref<128x128xbf16, #tpu.memory_space<vmem>>, %arg5: memref<1x128xf32, #tpu.memory_space<vmem>>, %arg6: memref<128x128xbf16, #tpu.memory_space<vmem>>, %arg7: memref<1x128xf32, #tpu.memory_space<vmem>>, %arg8: memref<8x128xf32, #tpu.memory_space<vmem>>) attributes {dimension_semantics = [#tpu.dimension_semantics<arbitrary>], iteration_bounds = array<i64: 1>, scalar_prefetch = 0 : i64, scratch_operands = 0 : i64, tpu.core_type = #tpu.core_type<tc>, window_params = [{transform_indices = @transform_0, window_bounds = array<i64: 8, 256>}, {pipeline_mode = #tpu.pipeline_mode<synchronous>, transform_indices = @transform_1, window_bounds = array<i64: 256, 128>}, {pipeline_mode = #tpu.pipeline_mode<synchronous>, transform_indices = @transform_2, window_bounds = array<i64: 1, 128>}, {pipeline_mode = #tpu.pipeline_mode<synchronous>, transform_indices = @transform_3, window_bounds = array<i64: 128, 128>}, {pipeline_mode = #tpu.pipeline_mode<synchronous>, transform_indices = @transform_4, window_bounds = array<i64: 1, 128>}, {pipeline_mode = #tpu.pipeline_mode<synchronous>, transform_indices = @transform_5, window_bounds = array<i64: 128, 128>}, {pipeline_mode = #tpu.pipeline_mode<synchronous>, transform_indices = @transform_6, window_bounds = array<i64: 1, 128>}, {transform_indices = @transform_7, window_bounds = array<i64: 8, 128>}]} {
    %c0 = arith.constant 0 : index
    %c0_0 = arith.constant 0 : index
    %0 = vector.load %arg1[%c0, %c0_0] : memref<8x256xf32, #tpu.memory_space<vmem>>, vector<8x256xf32>
    %1 = arith.truncf %0 : vector<8x256xf32> to vector<8x256xbf16>
    %c0_1 = arith.constant 0 : index
    %c0_2 = arith.constant 0 : index
    %2 = vector.load %arg2[%c0_1, %c0_2] : memref<256x128xbf16, #tpu.memory_space<vmem>>, vector<256x128xbf16>
    %cst = arith.constant dense<0.000000e+00> : vector<8x128xf32>
    %3 = tpu.matmul %1, %2, %cst {dimension_numbers = #tpu.dot_dimension_numbers<[1], [0], [0], [1], [0, 0, 1, 1], [], []>} : vector<8x256xbf16>, vector<256x128xbf16>, vector<8x128xf32> -> vector<8x128xf32>
    %c0_3 = arith.constant 0 : index
    %c0_4 = arith.constant 0 : index
    %4 = vector.load %arg3[%c0_3, %c0_4] : memref<1x128xf32, #tpu.memory_space<vmem>>, vector<1x128xf32>
    %5 = vector.broadcast %4 : vector<1x128xf32> to vector<8x128xf32>
    %6 = arith.addf %3, %5 : vector<8x128xf32>
    %cst_5 = arith.constant 0.000000e+00 : f32
    %7 = vector.broadcast %cst_5 : f32 to vector<8x128xf32>
    %8 = arith.maximumf %6, %7 : vector<8x128xf32>
    %9 = arith.truncf %8 : vector<8x128xf32> to vector<8x128xbf16>
    %c0_6 = arith.constant 0 : index
    %c0_7 = arith.constant 0 : index
    %10 = vector.load %arg4[%c0_6, %c0_7] : memref<128x128xbf16, #tpu.memory_space<vmem>>, vector<128x128xbf16>
    %cst_8 = arith.constant dense<0.000000e+00> : vector<8x128xf32>
    %11 = tpu.matmul %9, %10, %cst_8 {dimension_numbers = #tpu.dot_dimension_numbers<[1], [0], [0], [1], [0, 0, 1, 1], [], []>} : vector<8x128xbf16>, vector<128x128xbf16>, vector<8x128xf32> -> vector<8x128xf32>
    %c0_9 = arith.constant 0 : index
    %c0_10 = arith.constant 0 : index
    %12 = vector.load %arg5[%c0_9, %c0_10] : memref<1x128xf32, #tpu.memory_space<vmem>>, vector<1x128xf32>
    %13 = vector.broadcast %12 : vector<1x128xf32> to vector<8x128xf32>
    %14 = arith.addf %11, %13 : vector<8x128xf32>
    %cst_11 = arith.constant 0.000000e+00 : f32
    %15 = vector.broadcast %cst_11 : f32 to vector<8x128xf32>
    %16 = arith.maximumf %14, %15 : vector<8x128xf32>
    %17 = arith.truncf %16 : vector<8x128xf32> to vector<8x128xbf16>
    %c0_12 = arith.constant 0 : index
    %c0_13 = arith.constant 0 : index
    %18 = vector.load %arg6[%c0_12, %c0_13] : memref<128x128xbf16, #tpu.memory_space<vmem>>, vector<128x128xbf16>
    %cst_14 = arith.constant dense<0.000000e+00> : vector<8x128xf32>
    %19 = tpu.matmul %17, %18, %cst_14 {dimension_numbers = #tpu.dot_dimension_numbers<[1], [0], [0], [1], [0, 0, 1, 1], [], []>} : vector<8x128xbf16>, vector<128x128xbf16>, vector<8x128xf32> -> vector<8x128xf32>
    %c0_15 = arith.constant 0 : index
    %c0_16 = arith.constant 0 : index
    %20 = vector.load %arg7[%c0_15, %c0_16] : memref<1x128xf32, #tpu.memory_space<vmem>>, vector<1x128xf32>
    %21 = vector.broadcast %20 : vector<1x128xf32> to vector<8x128xf32>
    %22 = arith.addf %19, %21 : vector<8x128xf32>
    %c0_17 = arith.constant 0 : index
    %c0_18 = arith.constant 0 : index
    %23 = vector.load %arg8[%c0_17, %c0_18] : memref<8x128xf32, #tpu.memory_space<vmem>>, vector<8x128xf32>
    tpu.vector_store %arg8[%c0_17, %c0_18], %22 {strides = array<i32>} : memref<8x128xf32, #tpu.memory_space<vmem>>, vector<8x128xf32>,
    return
  }
  func.func @transform_0(%arg0: i32) -> (i32, i32) {
    %c0_i32 = arith.constant 0 : i32
    %c0_i32_0 = arith.constant 0 : i32
    return %arg0, %c0_i32 : i32, i32
  }
  func.func @transform_1(%arg0: i32) -> (i32, i32) {
    %c0_i32 = arith.constant 0 : i32
    %c0_i32_0 = arith.constant 0 : i32
    %c0_i32_1 = arith.constant 0 : i32
    return %c0_i32, %c0_i32_0 : i32, i32
  }
  func.func @transform_2(%arg0: i32) -> (i32, i32) {
    %c0_i32 = arith.constant 0 : i32
    %c0_i32_0 = arith.constant 0 : i32
    %c0_i32_1 = arith.constant 0 : i32
    return %c0_i32, %c0_i32_0 : i32, i32
  }
  func.func @transform_3(%arg0: i32) -> (i32, i32) {
    %c0_i32 = arith.constant 0 : i32
    %c0_i32_0 = arith.constant 0 : i32
    %c0_i32_1 = arith.constant 0 : i32
    return %c0_i32, %c0_i32_0 : i32, i32
  }
  func.func @transform_4(%arg0: i32) -> (i32, i32) {
    %c0_i32 = arith.constant 0 : i32
    %c0_i32_0 = arith.constant 0 : i32
    %c0_i32_1 = arith.constant 0 : i32
    return %c0_i32, %c0_i32_0 : i32, i32
  }
  func.func @transform_5(%arg0: i32) -> (i32, i32) {
    %c0_i32 = arith.constant 0 : i32
    %c0_i32_0 = arith.constant 0 : i32
    %c0_i32_1 = arith.constant 0 : i32
    return %c0_i32, %c0_i32_0 : i32, i32
  }
  func.func @transform_6(%arg0: i32) -> (i32, i32) {
    %c0_i32 = arith.constant 0 : i32
    %c0_i32_0 = arith.constant 0 : i32
    %c0_i32_1 = arith.constant 0 : i32
    return %c0_i32, %c0_i32_0 : i32, i32
  }
  func.func @transform_7(%arg0: i32) -> (i32, i32) {
    %c0_i32 = arith.constant 0 : i32
    %c0_i32_0 = arith.constant 0 : i32
    return %arg0, %c0_i32 : i32, i32
  }
}

module attributes {stable_mosaic.version = 11 : i64} {
  func.func @kernel(%arg0: i32, %arg1: memref<8x256xf32, #tpu.memory_space<vmem>>, %arg2: memref<256x128xbf16, #tpu.memory_space<vmem>>, %arg3: memref<1x128xf32, #tpu.memory_space<vmem>>, %arg4: memref<128x128xbf16, #tpu.memory_space<vmem>>, %arg5: memref<1x128xf32, #tpu.memory_space<vmem>>, %arg6: memref<128x128xbf16, #tpu.memory_space<vmem>>, %arg7: memref<1x128xf32, #tpu.memory_space<vmem>>, %arg8: memref<8x128xf32, #tpu.memory_space<vmem>>) attributes {dimension_semantics = [#tpu.dimension_semantics<arbitrary>], iteration_bounds = array<i64: 1>, scalar_prefetch = 0 : i64, scratch_operands = 0 : i64, tpu.core_type = #tpu.core_type<tc>, window_params = [{transform_indices = @transform_0, window_bounds = array<i64: 8, 256>}, {pipeline_mode = #tpu.pipeline_mode<synchronous>, transform_indices = @transform_1, window_bounds = array<i64: 256, 128>}, {pipeline_mode = #tpu.pipeline_mode<synchronous>, transform_indices = @transform_2, window_bounds = array<i64: 1, 128>}, {pipeline_mode = #tpu.pipeline_mode<synchronous>, transform_indices = @transform_3, window_bounds = array<i64: 128, 128>}, {pipeline_mode = #tpu.pipeline_mode<synchronous>, transform_indices = @transform_4, window_bounds = array<i64: 1, 128>}, {pipeline_mode = #tpu.pipeline_mode<synchronous>, transform_indices = @transform_5, window_bounds = array<i64: 128, 128>}, {pipeline_mode = #tpu.pipeline_mode<synchronous>, transform_indices = @transform_6, window_bounds = array<i64: 1, 128>}, {transform_indices = @transform_7, window_bounds = array<i64: 8, 128>}]} {
    %c0 = arith.constant 0 : index
    %c0_0 = arith.constant 0 : index
    %0 = vector.load %arg1[%c0, %c0_0] : memref<8x256xf32, #tpu.memory_space<vmem>>, vector<8x256xf32>
    %1 = arith.truncf %0 : vector<8x256xf32> to vector<8x256xbf16>
    %c0_1 = arith.constant 0 : index
    %c0_2 = arith.constant 0 : index
    %2 = vector.load %arg2[%c0_1, %c0_2] : memref<256x128xbf16, #tpu.memory_space<vmem>>, vector<256x128xbf16>
    %cst = arith.constant dense<0.000000e+00> : vector<8x128xf32>
    %3 = tpu.matmul %1, %2, %cst {dimension_numbers = #tpu.dot_dimension_numbers<[1], [0], [0], [1], [0, 0, 1, 1], [], []>} : vector<8x256xbf16>, vector<256x128xbf16>, vector<8x128xf32> -> vector<8x128xf32>
    %c0_3 = arith.constant 0 : index
    %c0_4 = arith.constant 0 : index
    %4 = vector.load %arg3[%c0_3, %c0_4] : memref<1x128xf32, #tpu.memory_space<vmem>>, vector<1x128xf32>
    %5 = vector.broadcast %4 : vector<1x128xf32> to vector<8x128xf32>
    %6 = arith.addf %3, %5 : vector<8x128xf32>
    %cst_5 = arith.constant 0.000000e+00 : f32
    %7 = vector.broadcast %cst_5 : f32 to vector<8x128xf32>
    %8 = arith.maximumf %6, %7 : vector<8x128xf32>
    %9 = arith.truncf %8 : vector<8x128xf32> to vector<8x128xbf16>
    %c0_6 = arith.constant 0 : index
    %c0_7 = arith.constant 0 : index
    %10 = vector.load %arg4[%c0_6, %c0_7] : memref<128x128xbf16, #tpu.memory_space<vmem>>, vector<128x128xbf16>
    %cst_8 = arith.constant dense<0.000000e+00> : vector<8x128xf32>
    %11 = tpu.matmul %9, %10, %cst_8 {dimension_numbers = #tpu.dot_dimension_numbers<[1], [0], [0], [1], [0, 0, 1, 1], [], []>} : vector<8x128xbf16>, vector<128x128xbf16>, vector<8x128xf32> -> vector<8x128xf32>
    %c0_9 = arith.constant 0 : index
    %c0_10 = arith.constant 0 : index
    %12 = vector.load %arg5[%c0_9, %c0_10] : memref<1x128xf32, #tpu.memory_space<vmem>>, vector<1x128xf32>
    %13 = vector.broadcast %12 : vector<1x128xf32> to vector<8x128xf32>
    %14 = arith.addf %11, %13 : vector<8x128xf32>
    %cst_11 = arith.constant 0.000000e+00 : f32
    %15 = vector.broadcast %cst_11 : f32 to vector<8x128xf32>
    %16 = arith.maximumf %14, %15 : vector<8x128xf32>
    %17 = arith.truncf %16 : vector<8x128xf32> to vector<8x128xbf16>
    %c0_12 = arith.constant 0 : index
    %c0_13 = arith.constant 0 : index
    %18 = vector.load %arg6[%c0_12, %c0_13] : memref<128x128xbf16, #tpu.memory_space<vmem>>, vector<128x128xbf16>
    %cst_14 = arith.constant dense<0.000000e+00> : vector<8x128xf32>
    %19 = tpu.matmul %17, %18, %cst_14 {dimension_numbers = #tpu.dot_dimension_numbers<[1], [0], [0], [1], [0, 0, 1, 1], [], []>} : vector<8x128xbf16>, vector<128x128xbf16>, vector<8x128xf32> -> vector<8x128xf32>
    %c0_15 = arith.constant 0 : index
    %c0_16 = arith.constant 0 : index
    %20 = vector.load %arg7[%c0_15, %c0_16] : memref<1x128xf32, #tpu.memory_space<vmem>>, vector<1x128xf32>
    %21 = vector.broadcast %20 : vector<1x128xf32> to vector<8x128xf32>
    %22 = arith.addf %19, %21 : vector<8x128xf32>
    %c0_17 = arith.constant 0 : index
    %c0_18 = arith.constant 0 : index
    %23 = vector.load %arg8[%c0_17, %c0_18] : memref<8x128xf32, #tpu.memory_space<vmem>>, vector<8x128xf32>
    tpu.vector_store %arg8[%c0_17, %c0_18], %22 {strides = array<i32>} : memref<8x128xf32, #tpu.memory_space<vmem>>, vector<8x128xf32>,
    return
  }
  func.func @transform_0(%arg0: i32) -> (i32, i32) {
    %c0_i32 = arith.constant 0 : i32
    %c0_i32_0 = arith.constant 0 : i32
    return %arg0, %c0_i32 : i32, i32
  }
  func.func @transform_1(%arg0: i32) -> (i32, i32) {
    %c0_i32 = arith.constant 0 : i32
    %c0_i32_0 = arith.constant 0 : i32
    %c0_i32_1 = arith.constant 0 : i32
    return %c0_i32, %c0_i32_0 : i32, i32
  }
  func.func @transform_2(%arg0: i32) -> (i32, i32) {
    %c0_i32 = arith.constant 0 : i32
    %c0_i32_0 = arith.constant 0 : i32
    %c0_i32_1 = arith.constant 0 : i32
    return %c0_i32, %c0_i32_0 : i32, i32
  }
  func.func @transform_3(%arg0: i32) -> (i32, i32) {
    %c0_i32 = arith.constant 0 : i32
    %c0_i32_0 = arith.constant 0 : i32
    %c0_i32_1 = arith.constant 0 : i32
    return %c0_i32, %c0_i32_0 : i32, i32
  }
  func.func @transform_4(%arg0: i32) -> (i32, i32) {
    %c0_i32 = arith.constant 0 : i32
    %c0_i32_0 = arith.constant 0 : i32
    %c0_i32_1 = arith.constant 0 : i32
    return %c0_i32, %c0_i32_0 : i32, i32
  }
  func.func @transform_5(%arg0: i32) -> (i32, i32) {
    %c0_i32 = arith.constant 0 : i32
    %c0_i32_0 = arith.constant 0 : i32
    %c0_i32_1 = arith.constant 0 : i32
    return %c0_i32, %c0_i32_0 : i32, i32
  }
  func.func @transform_6(%arg0: i32) -> (i32, i32) {
    %c0_i32 = arith.constant 0 : i32
    %c0_i32_0 = arith.constant 0 : i32
    %c0_i32_1 = arith.constant 0 : i32
    return %c0_i32, %c0_i32_0 : i32, i32
  }
  func.func @transform_7(%arg0: i32) -> (i32, i32) {
    %c0_i32 = arith.constant 0 : i32
    %c0_i32_0 = arith.constant 0 : i32
    return %arg0, %c0_i32 : i32, i32
  }
}

</mosaic_0001>

<bundles_post_ra>
// kernel: fwd.1
= control target key start
LH: loop header
LB: loop body
LE: loop exit
PB: predicated region body
PF: predicated region fallthrough
CT: control target
= control target key end

     0   :  { %12 = vsyncpa [#allocation3], 0  ;;  %s724_s0 = inlined_call_operand.vmem [shape: f32[8,256], index: 0, kind: input, shape index: {}]   ;;  %s725_s1 = inlined_call_operand.hbm [shape: bf16[256,128], index: 1, kind: input, shape index: {}]   ;;  %s726_s2 = inlined_call_operand.vmem [shape: f32[1,128], index: 2, kind: input, shape index: {}]   ;;  %s727_s3 = inlined_call_operand.hbm [shape: bf16[128,128], index: 3, kind: input, shape index: {}]   ;;  %s728_s4 = inlined_call_operand.vmem [shape: f32[1,128], index: 4, kind: input, shape index: {}]   ;;  %s729_s5 = inlined_call_operand.hbm [shape: bf16[128,128], index: 5, kind: input, shape index: {}]   ;;  %s730_s6 = inlined_call_operand.vmem [shape: f32[1,128], index: 6, kind: input, shape index: {}]   ;;  %s731_s7 = inlined_call_operand.vmem [shape: f32[8,128], index: 7, kind: output, shape index: {}]  }
   0x1   :  { %13 = vsyncpa [#allocation5], 0  ;;  %s35_s26 = sshll.u32 %s727_s3, 4  ;;  %s652_s27 = smov [#allocation4]   ;;  %s36_s26 = int_to_ptr.hbm [resolvable:$true] %s35_s26 }
   0x2   :  { %s37_s28 = sshll.u32 %s652_s27, 4  ;;  %s20_s8 = sshll.u32 %s725_s1, 4  ;;  %s38_s28 = int_to_ptr.vmem [resolvable:$true] %s37_s28  ;;  %s21_s8 = int_to_ptr.hbm [resolvable:$true] %s20_s8 }
   0x3   :  { %s653_s9 = smov 64   ;;  %s654_s10 = smov 4  }
   0x4   :  { %43 = dma.hbm_to_vmem [thread:$0]  %s36_s26, 1024, %s38_s28, [#allocation5], %s653_s9, %s653_s9, %s654_s10  }
   0x5   :  { %s655_s11 = smov [#allocation2]   ;;  %s50_s15 = sshll.u32 %s729_s5, 4  ;;  %s51_s15 = int_to_ptr.hbm [resolvable:$true] %s50_s15 }
   0x6   :  { %s22_s12 = sshll.u32 %s655_s11, 4  ;;  %s656_s3 = smov [#allocation6]   ;;  %s23_s12 = int_to_ptr.vmem [resolvable:$true] %s22_s12 }
   0x7   :  { %28 = dma.hbm_to_vmem [thread:$0]  %s21_s8, 2048, %s23_s12, [#allocation3], %s653_s9, %s653_s9, %s654_s10  }
   0x8   :  { %s52_s16 = sshll.u32 %s656_s3, 4  ;;  %s53_s16 = int_to_ptr.vmem [resolvable:$true] %s52_s16 }
   0x9   :  { %58 = dma.hbm_to_vmem [thread:$0]  %s51_s15, 1024, %s53_s16, [#allocation5], %s653_s9, %s653_s9, %s654_s10  }
   0xa   :  { %648 = dma.done.wait [#allocation3], 2048  }
   0xb   :  { %649 = vsyncadd [#allocation3], 4294965248 }
   0xc   :  { %650 = dma.done.wait [#allocation5], 2048  }
   0xd   :  { %651 = vsyncadd [#allocation5], 4294965248  ;;  %v543_v0 = vld [vmem:[#allocation2 + $0x38] sm:$0xff]  ;;  %v542_v2 = vld [vmem:[#allocation2 + $0x30] sm:$0xff] }
   0xe   :  { %v551_v1 = vld [vmem:[#allocation2 + $0x78] sm:$0xff]  ;;  %209 = vmatpush.bf16.msra.mxu0 %v543_v0  ;;  %v550_v3 = vld [vmem:[#allocation2 + $0x70] sm:$0xff]  ;;  %v541_v4 = vld [vmem:[#allocation2 + $0x28] sm:$0xff] }
   0xf   :  { %222 = vmatpush.bf16.msra.mxu1 %v551_v1  ;;  %v549_v5 = vld [vmem:[#allocation2 + $0x68] sm:$0xff]  ;;  %v559_v6 = vld [vmem:[#allocation4 + $0x38] sm:$0xff]  ;;  %v558_v7 = vld [vmem:[#allocation4 + $0x30] sm:$0xff] }
  0x10   :  { %305 = vmatpush.bf16.msra.mxu2 %v559_v6  ;;  %v540_v8 = vld [vmem:[#allocation2 + $0x20] sm:$0xff]  ;;  %v557_v10 = vld [vmem:[#allocation4 + $0x28] sm:$0xff]  ;;  %v539_v11 = vld [vmem:[#allocation2 + $0x18] sm:$0xff] }
  0x11   :  { %v548_v9 = vld [vmem:[#allocation2 + $0x60] sm:$0xff]  ;;  %v547_v12 = vld [vmem:[#allocation2 + $0x58] sm:$0xff]  ;;  %v538_v14 = vld [vmem:[#allocation2 + $0x10] sm:$0xff] }
  0x12   :  { %210 = vmatpush.bf16.msra.mxu0 %v542_v2  ;;  %v556_v13 = vld [vmem:[#allocation4 + $0x20] sm:$0xff]  ;;  %v546_v15 = vld [vmem:[#allocation2 + $0x50] sm:$0xff]  ;;  %v555_v16 = vld [vmem:[#allocation4 + $0x18] sm:$0xff] }
  0x13   :  { %223 = vmatpush.bf16.msra.mxu1 %v550_v3  ;;  %v537_v17 = vld [vmem:[#allocation2 + $0x8] sm:$0xff]  ;;  %v554_v19 = vld [vmem:[#allocation4 + $0x10] sm:$0xff]  ;;  %v536_v20 = vld [vmem:[#allocation2] sm:$0xff] }
  0x14   :  { %306 = vmatpush.bf16.msra.mxu2 %v558_v7  ;;  %v545_v18 = vld [vmem:[#allocation2 + $0x48] sm:$0xff]  ;;  %v544_v21 = vld [vmem:[#allocation2 + $0x40] sm:$0xff]  ;;  %v567_v28 = vld [vmem:[#allocation6 + $0x38] sm:$0xff] }
  0x15   :  { %v73_v22 = vld [vmem:[%s724_s0] sm:$0xff]  ;;  %v74_v23 = vld [vmem:[%s724_s0 + $0x8] sm:$0xff]  ;;  %388 = vmatpush.bf16.msra.mxu3 %v567_v28  ;;  %v566_v29 = vld [vmem:[#allocation6 + $0x30] sm:$0xff] }
  0x16   :  { %211 = vmatpush.bf16.msra.mxu0 %v541_v4  ;;  %v75_v24 = vpack.c.bf16 %v73_v22, %v73_v22  ;;  %v76_v25 = vpack.c.bf16 %v74_v23, %v74_v23  ;;  %v553_v26 = vld [vmem:[#allocation4 + $0x8] sm:$0xff]  ;;  %v552_v27 = vld [vmem:[#allocation4] sm:$0xff]  ;;  %v563_v32 = vld [vmem:[#allocation6 + $0x18] sm:$0xff] }
  0x17   :  { %224 = vmatpush.bf16.msra.mxu1 %v549_v5  ;;  %v565_v30 = vld [vmem:[#allocation6 + $0x28] sm:$0xff]  ;;  %v564_v31 = vld [vmem:[#allocation6 + $0x20] sm:$0xff]  ;;  %v562_v33 = vld [vmem:[#allocation6 + $0x10] sm:$0xff] }
  0x18   :  { %307 = vmatpush.bf16.msra.mxu2 %v557_v10  ;;  %v573_v34 = vld [vmem:[%s726_s2] ss:$0 sm:$0xff]  ;;  %v561_v43 = vld [vmem:[#allocation6 + $0x8] sm:$0xff] }
  0x19   :  { %389 = vmatpush.bf16.msra.mxu3 %v566_v29  ;;  %v560_v44 = vld [vmem:[#allocation6] sm:$0xff] }
  0x1a   :  { %212 = vmatpush.bf16.msra.mxu0 %v540_v8  ;;  %v574_v45 = vld [vmem:[%s728_s4] ss:$0 sm:$0xff] }
  0x1b   :  { %225 = vmatpush.bf16.msra.mxu1 %v548_v9  ;;  %v575_v51 = vld [vmem:[%s730_s6] ss:$0 sm:$0xff] }
  0x1c   :  { %308 = vmatpush.bf16.msra.mxu2 %v556_v13 }
  0x1d   :  { %390 = vmatpush.bf16.msra.mxu3 %v565_v30 }
  0x1e   :  { %213 = vmatpush.bf16.msra.mxu0 %v539_v11 }
  0x1f   :  { %226 = vmatpush.bf16.msra.mxu1 %v547_v12 }
  0x20   :  { %309 = vmatpush.bf16.msra.mxu2 %v555_v16 }
  0x21   :  { %391 = vmatpush.bf16.msra.mxu3 %v564_v31 }
  0x22   :  { %214 = vmatpush.bf16.msra.mxu0 %v538_v14 }
  0x23   :  { %227 = vmatpush.bf16.msra.mxu1 %v546_v15 }
  0x24   :  { %310 = vmatpush.bf16.msra.mxu2 %v554_v19 }
  0x25   :  { %392 = vmatpush.bf16.msra.mxu3 %v563_v32 }
  0x26   :  { %215 = vmatpush.bf16.msra.mxu0 %v537_v17 }
  0x27   :  { %228 = vmatpush.bf16.msra.mxu1 %v545_v18 }
  0x28   :  { %311 = vmatpush.bf16.msra.mxu2 %v553_v26 }
  0x29   :  { %393 = vmatpush.bf16.msra.mxu3 %v562_v33 }
  0x2a   :  { %216 = vmatpush.bf16.msra.mxu0 %v536_v20 }
  0x2b   :  { %229 = vmatpush.bf16.msra.mxu1 %v544_v21 }
  0x2c   :  { %312 = vmatpush.bf16.msra.mxu2 %v552_v27 }
  0x2d   :  { %217 = vmatmul.bf16.vlgmr.msra.gmra.mxu0 %v75_v24  ;;  %394 = vmatpush.bf16.msra.mxu3 %v561_v43 }
  0x2e   :  { %230 = vmatmul.bf16.vlgmr.msra.gmra.mxu1 %v76_v25 }
  0x31   :  { %395 = vmatpush.bf16.msra.mxu3 %v560_v44 }
  0xaa   :  { %v218_v35 = vpop.f32.mrf.mxu0 }
  0xab   :  { %v231_v36 = vpop.f32.mrf.mxu1  ;;  %v219_v37 = vadd.f32 %v573_v34, %v218_v35 }
  0xad   :  { %v232_v38 = vadd.f32 %v231_v36, %v219_v37 }
  0xaf   :  { %v235_v39 = vmax.f32 %v232_v38, 0.0 }
  0xb1   :  { %v236_v40 = vpack.c.bf16 %v235_v39, %v235_v39 }
  0xb2   :  { %v220_v41 = vpop.f32.mrf.mxu0 }
  0xb3   :  { %v233_v42 = vpop.f32.mrf.mxu1  ;;  %313 = vmatmul.bf16.vlgmr.msra.gmra.mxu2 %v236_v40 }
 0x136   :  { %v314_v46 = vpop.f32.mrf.mxu2 }
 0x137   :  { %v315_v47 = vadd.f32 %v574_v45, %v314_v46 }
 0x139   :  { %v318_v48 = vmax.f32 %v315_v47, 0.0 }
 0x13b   :  { %v319_v49 = vpack.c.bf16 %v318_v48, %v318_v48 }
 0x13d   :  { %396 = vmatmul.bf16.vlgmr.msra.gmra.mxu3 %v319_v49 }
 0x13e   :  { %v316_v50 = vpop.f32.mrf.mxu2 }
 0x1c0   :  { %v397_v52 = vpop.f32.mrf.mxu3 }
 0x1c1   :  { %v398_v53 = vadd.f32 %v575_v51, %v397_v52 }
 0x1c3   :  { %401 = vst [vmem:[%s731_s7] sm:$0xff] %v398_v53 }
 0x1c8   :  { %v399_v54 = vpop.f32.mrf.mxu3 }
 0x1c9   :  { %406 = vsyncpa [#allocation3], 1 }
 0x1ca   :  { %407 = vsyncpa [#allocation5], 1 }

// kernel: fwd.1
= control target key start
LH: loop header
LB: loop body
LE: loop exit
PB: predicated region body
PF: predicated region fallthrough
CT: control target
= control target key end

     0   :  { %12 = vsyncpa [#allocation3], 0  ;;  %s724_s0 = inlined_call_operand.vmem [shape: f32[8,256], index: 0, kind: input, shape index: {}]   ;;  %s725_s1 = inlined_call_operand.hbm [shape: bf16[256,128], index: 1, kind: input, shape index: {}]   ;;  %s726_s2 = inlined_call_operand.vmem [shape: f32[1,128], index: 2, kind: input, shape index: {}]   ;;  %s727_s3 = inlined_call_operand.hbm [shape: bf16[128,128], index: 3, kind: input, shape index: {}]   ;;  %s728_s4 = inlined_call_operand.vmem [shape: f32[1,128], index: 4, kind: input, shape index: {}]   ;;  %s729_s5 = inlined_call_operand.hbm [shape: bf16[128,128], index: 5, kind: input, shape index: {}]   ;;  %s730_s6 = inlined_call_operand.vmem [shape: f32[1,128], index: 6, kind: input, shape index: {}]   ;;  %s731_s7 = inlined_call_operand.vmem [shape: f32[8,128], index: 7, kind: output, shape index: {}]  }
   0x1   :  { %13 = vsyncpa [#allocation5], 0  ;;  %s35_s26 = sshll.u32 %s727_s3, 4  ;;  %s652_s27 = smov [#allocation4]   ;;  %s36_s26 = int_to_ptr.hbm [resolvable:$true] %s35_s26 }
   0x2   :  { %s37_s28 = sshll.u32 %s652_s27, 4  ;;  %s20_s8 = sshll.u32 %s725_s1, 4  ;;  %s38_s28 = int_to_ptr.vmem [resolvable:$true] %s37_s28  ;;  %s21_s8 = int_to_ptr.hbm [resolvable:$true] %s20_s8 }
   0x3   :  { %s653_s9 = smov 64   ;;  %s654_s10 = smov 4  }
   0x4   :  { %43 = dma.hbm_to_vmem [thread:$0]  %s36_s26, 1024, %s38_s28, [#allocation5], %s653_s9, %s653_s9, %s654_s10  }
   0x5   :  { %s655_s11 = smov [#allocation2]   ;;  %s50_s15 = sshll.u32 %s729_s5, 4  ;;  %s51_s15 = int_to_ptr.hbm [resolvable:$true] %s50_s15 }
   0x6   :  { %s22_s12 = sshll.u32 %s655_s11, 4  ;;  %s656_s3 = smov [#allocation6]   ;;  %s23_s12 = int_to_ptr.vmem [resolvable:$true] %s22_s12 }
   0x7   :  { %28 = dma.hbm_to_vmem [thread:$0]  %s21_s8, 2048, %s23_s12, [#allocation3], %s653_s9, %s653_s9, %s654_s10  }
   0x8   :  { %s52_s16 = sshll.u32 %s656_s3, 4  ;;  %s53_s16 = int_to_ptr.vmem [resolvable:$true] %s52_s16 }
   0x9   :  { %58 = dma.hbm_to_vmem [thread:$0]  %s51_s15, 1024, %s53_s16, [#allocation5], %s653_s9, %s653_s9, %s654_s10  }
   0xa   :  { %648 = dma.done.wait [#allocation3], 2048  }
   0xb   :  { %649 = vsyncadd [#allocation3], 4294965248 }
   0xc   :  { %650 = dma.done.wait [#allocation5], 2048  }
   0xd   :  { %651 = vsyncadd [#allocation5], 4294965248  ;;  %v543_v0 = vld [vmem:[#allocation2 + $0x38] sm:$0xff]  ;;  %v542_v2 = vld [vmem:[#allocation2 + $0x30] sm:$0xff] }
   0xe   :  { %v551_v1 = vld [vmem:[#allocation2 + $0x78] sm:$0xff]  ;;  %209 = vmatpush.bf16.msra.mxu0 %v543_v0  ;;  %v550_v3 = vld [vmem:[#allocation2 + $0x70] sm:$0xff]  ;;  %v541_v4 = vld [vmem:[#allocation2 + $0x28] sm:$0xff] }
   0xf   :  { %222 = vmatpush.bf16.msra.mxu1 %v551_v1  ;;  %v549_v5 = vld [vmem:[#allocation2 + $0x68] sm:$0xff]  ;;  %v559_v6 = vld [vmem:[#allocation4 + $0x38] sm:$0xff]  ;;  %v558_v7 = vld [vmem:[#allocation4 + $0x30] sm:$0xff] }
  0x10   :  { %305 = vmatpush.bf16.msra.mxu2 %v559_v6  ;;  %v540_v8 = vld [vmem:[#allocation2 + $0x20] sm:$0xff]  ;;  %v557_v10 = vld [vmem:[#allocation4 + $0x28] sm:$0xff]  ;;  %v539_v11 = vld [vmem:[#allocation2 + $0x18] sm:$0xff] }
  0x11   :  { %v548_v9 = vld [vmem:[#allocation2 + $0x60] sm:$0xff]  ;;  %v547_v12 = vld [vmem:[#allocation2 + $0x58] sm:$0xff]  ;;  %v538_v14 = vld [vmem:[#allocation2 + $0x10] sm:$0xff] }
  0x12   :  { %210 = vmatpush.bf16.msra.mxu0 %v542_v2  ;;  %v556_v13 = vld [vmem:[#allocation4 + $0x20] sm:$0xff]  ;;  %v546_v15 = vld [vmem:[#allocation2 + $0x50] sm:$0xff]  ;;  %v555_v16 = vld [vmem:[#allocation4 + $0x18] sm:$0xff] }
  0x13   :  { %223 = vmatpush.bf16.msra.mxu1 %v550_v3  ;;  %v537_v17 = vld [vmem:[#allocation2 + $0x8] sm:$0xff]  ;;  %v554_v19 = vld [vmem:[#allocation4 + $0x10] sm:$0xff]  ;;  %v536_v20 = vld [vmem:[#allocation2] sm:$0xff] }
  0x14   :  { %306 = vmatpush.bf16.msra.mxu2 %v558_v7  ;;  %v545_v18 = vld [vmem:[#allocation2 + $0x48] sm:$0xff]  ;;  %v544_v21 = vld [vmem:[#allocation2 + $0x40] sm:$0xff]  ;;  %v567_v28 = vld [vmem:[#allocation6 + $0x38] sm:$0xff] }
  0x15   :  { %v73_v22 = vld [vmem:[%s724_s0] sm:$0xff]  ;;  %v74_v23 = vld [vmem:[%s724_s0 + $0x8] sm:$0xff]  ;;  %388 = vmatpush.bf16.msra.mxu3 %v567_v28  ;;  %v566_v29 = vld [vmem:[#allocation6 + $0x30] sm:$0xff] }
  0x16   :  { %211 = vmatpush.bf16.msra.mxu0 %v541_v4  ;;  %v75_v24 = vpack.c.bf16 %v73_v22, %v73_v22  ;;  %v76_v25 = vpack.c.bf16 %v74_v23, %v74_v23  ;;  %v553_v26 = vld [vmem:[#allocation4 + $0x8] sm:$0xff]  ;;  %v552_v27 = vld [vmem:[#allocation4] sm:$0xff]  ;;  %v563_v32 = vld [vmem:[#allocation6 + $0x18] sm:$0xff] }
  0x17   :  { %224 = vmatpush.bf16.msra.mxu1 %v549_v5  ;;  %v565_v30 = vld [vmem:[#allocation6 + $0x28] sm:$0xff]  ;;  %v564_v31 = vld [vmem:[#allocation6 + $0x20] sm:$0xff]  ;;  %v562_v33 = vld [vmem:[#allocation6 + $0x10] sm:$0xff] }
  0x18   :  { %307 = vmatpush.bf16.msra.mxu2 %v557_v10  ;;  %v573_v34 = vld [vmem:[%s726_s2] ss:$0 sm:$0xff]  ;;  %v561_v43 = vld [vmem:[#allocation6 + $0x8] sm:$0xff] }
  0x19   :  { %389 = vmatpush.bf16.msra.mxu3 %v566_v29  ;;  %v560_v44 = vld [vmem:[#allocation6] sm:$0xff] }
  0x1a   :  { %212 = vmatpush.bf16.msra.mxu0 %v540_v8  ;;  %v574_v45 = vld [vmem:[%s728_s4] ss:$0 sm:$0xff] }
  0x1b   :  { %225 = vmatpush.bf16.msra.mxu1 %v548_v9  ;;  %v575_v51 = vld [vmem:[%s730_s6] ss:$0 sm:$0xff] }
  0x1c   :  { %308 = vmatpush.bf16.msra.mxu2 %v556_v13 }
  0x1d   :  { %390 = vmatpush.bf16.msra.mxu3 %v565_v30 }
  0x1e   :  { %213 = vmatpush.bf16.msra.mxu0 %v539_v11 }
  0x1f   :  { %226 = vmatpush.bf16.msra.mxu1 %v547_v12 }
  0x20   :  { %309 = vmatpush.bf16.msra.mxu2 %v555_v16 }
  0x21   :  { %391 = vmatpush.bf16.msra.mxu3 %v564_v31 }
  0x22   :  { %214 = vmatpush.bf16.msra.mxu0 %v538_v14 }
  0x23   :  { %227 = vmatpush.bf16.msra.mxu1 %v546_v15 }
  0x24   :  { %310 = vmatpush.bf16.msra.mxu2 %v554_v19 }
  0x25   :  { %392 = vmatpush.bf16.msra.mxu3 %v563_v32 }
  0x26   :  { %215 = vmatpush.bf16.msra.mxu0 %v537_v17 }
  0x27   :  { %228 = vmatpush.bf16.msra.mxu1 %v545_v18 }
  0x28   :  { %311 = vmatpush.bf16.msra.mxu2 %v553_v26 }
  0x29   :  { %393 = vmatpush.bf16.msra.mxu3 %v562_v33 }
  0x2a   :  { %216 = vmatpush.bf16.msra.mxu0 %v536_v20 }
  0x2b   :  { %229 = vmatpush.bf16.msra.mxu1 %v544_v21 }
  0x2c   :  { %312 = vmatpush.bf16.msra.mxu2 %v552_v27 }
  0x2d   :  { %217 = vmatmul.bf16.vlgmr.msra.gmra.mxu0 %v75_v24  ;;  %394 = vmatpush.bf16.msra.mxu3 %v561_v43 }
  0x2e   :  { %230 = vmatmul.bf16.vlgmr.msra.gmra.mxu1 %v76_v25 }
  0x31   :  { %395 = vmatpush.bf16.msra.mxu3 %v560_v44 }
  0xaa   :  { %v218_v35 = vpop.f32.mrf.mxu0 }
  0xab   :  { %v231_v36 = vpop.f32.mrf.mxu1  ;;  %v219_v37 = vadd.f32 %v573_v34, %v218_v35 }
  0xad   :  { %v232_v38 = vadd.f32 %v231_v36, %v219_v37 }
  0xaf   :  { %v235_v39 = vmax.f32 %v232_v38, 0.0 }
  0xb1   :  { %v236_v40 = vpack.c.bf16 %v235_v39, %v235_v39 }
  0xb2   :  { %v220_v41 = vpop.f32.mrf.mxu0 }
  0xb3   :  { %v233_v42 = vpop.f32.mrf.mxu1  ;;  %313 = vmatmul.bf16.vlgmr.msra.gmra.mxu2 %v236_v40 }
 0x136   :  { %v314_v46 = vpop.f32.mrf.mxu2 }
 0x137   :  { %v315_v47 = vadd.f32 %v574_v45, %v314_v46 }
 0x139   :  { %v318_v48 = vmax.f32 %v315_v47, 0.0 }
 0x13b   :  { %v319_v49 = vpack.c.bf16 %v318_v48, %v318_v48 }
 0x13d   :  { %396 = vmatmul.bf16.vlgmr.msra.gmra.mxu3 %v319_v49 }
 0x13e   :  { %v316_v50 = vpop.f32.mrf.mxu2 }
 0x1c0   :  { %v397_v52 = vpop.f32.mrf.mxu3 }
 0x1c1   :  { %v398_v53 = vadd.f32 %v575_v51, %v397_v52 }
 0x1c3   :  { %401 = vst [vmem:[%s731_s7] sm:$0xff] %v398_v53 }
 0x1c8   :  { %v399_v54 = vpop.f32.mrf.mxu3 }
 0x1c9   :  { %406 = vsyncpa [#allocation3], 1 }
 0x1ca   :  { %407 = vsyncpa [#allocation5], 1 }

</bundles_post_ra>
